<compile_context>
chip_gen: v6e
topology: v6e:2x2x1
jax: 0.10.0
libtpu: 0.0.40
codegen_flags: <defaults>
</compile_context>

<pallas_src>
import jax
import jax.numpy as jnp
from jax.experimental import pallas as pl
from jax.experimental.pallas import tpu as pltpu


def _round_up(x, m):
    return (x + m - 1) // m * m


# --------------------------------------------------------------------------
# Kernels
# --------------------------------------------------------------------------
def _rnn_cell_kernel(emb_ref, hid_ref, a_emb_ref, a_hid_ref, b_ref, slab_ref):
    """Single RNN step.  slab cols [0,H) = new hidden, cols [H,H+E) = o2o output."""
    slab = (
        jnp.dot(emb_ref[...], a_emb_ref[...], preferred_element_type=jnp.float32)
        + jnp.dot(hid_ref[...], a_hid_ref[...], preferred_element_type=jnp.float32)
        + b_ref[...]
    )
    slab_ref[...] = slab.astype(slab_ref.dtype)


def _rnn_seq_kernel(h0_ref, emb_proj_ref, a_hid_ref,      # inputs
                    slab_seq_ref, h_out_ref,               # outputs
                    h_scratch):                            # VMEM scratch [B, H]
    """One grid step == one timestep.  emb_proj already holds emb@A_emb + b_total,
    so the only work on the serial recurrent path is the tiny hid @ A_hid matmul."""
    t = pl.program_id(0)

    @pl.when(t == 0)
    def _():
        h_scratch[...] = h0_ref[...]

    slab = emb_proj_ref[0] + jnp.dot(
        h_scratch[...], a_hid_ref[...], preferred_element_type=jnp.float32)
    slab_seq_ref[0] = slab.astype(slab_seq_ref.dtype)
    # New hidden lives in cols [0, H) of the slab (static offset-0 slice).
    h_scratch[...] = slab[:, : h_scratch.shape[1]]

    @pl.when(t == pl.num_programs(0) - 1)
    def _():
        h_out_ref[...] = h_scratch[...]


# --------------------------------------------------------------------------
# Parameter packing (offline, once)
# --------------------------------------------------------------------------
def pack_params(raw):
    """Fuse i2h+i2o+o2o (+hidden pass-through) into two [H, SLAB] weights + 1 bias."""
    w_i2h, b_i2h = raw["i2h_w"], raw["i2h_b"]   # [2H, H], [1, H]
    w_i2o, b_i2o = raw["i2o_w"], raw["i2o_b"]   # [2H, H], [1, H]
    w_o2o, b_o2o = raw["o2o_w"], raw["o2o_b"]   # [2H, E], [1, E]
    H = w_i2h.shape[1]
    E = w_o2o.shape[1]
    SLAB = _round_up(H + E, 128)
    hp = jax.lax.Precision.HIGHEST

    # Stage-1 fused weight; column order matches cat((hidden, output), 1).
    w_io = jnp.concatenate([w_i2h, w_i2o], axis=1)      # [2H, 2H]
    b_io = jnp.concatenate([b_i2h, b_i2o], axis=1)      # [1, 2H]

    # Stage-2 weight on the slab layout: cols [0,H) = identity (h_new pass-through),
    # cols [H,H+E) = o2o, rest zero-padded to 128 lanes.
    w_fin = jnp.zeros((2 * H, SLAB), jnp.float32)
    w_fin = w_fin.at[:H, :H].set(jnp.eye(H, dtype=jnp.float32))
    w_fin = w_fin.at[:, H:H + E].set(w_o2o)
    b_fin = jnp.zeros((1, SLAB), jnp.float32).at[:, H:H + E].set(b_o2o)

    # No nonlinearity between the stages -> pre-multiply offline (exact algebra).
    a_emb = jnp.dot(w_io[:H, :], w_fin, precision=hp)    # [H, SLAB]
    a_hid = jnp.dot(w_io[H:, :], w_fin, precision=hp)    # [H, SLAB]
    b_tot = jnp.dot(b_io, w_fin, precision=hp) + b_fin   # [1, SLAB]

    return {
        "embedding": raw["embedding"],
        "a_emb": a_emb, "a_hid": a_hid, "b_tot": b_tot,
        "H": H, "E": E, "SLAB": SLAB,
    }


# --------------------------------------------------------------------------
# Wrappers
# --------------------------------------------------------------------------
def rnn_forward(input_ids, hidden, packed):
    """Mirrors RNN.forward: returns (output [B, E], new_hidden [B, H])."""
    B = input_ids.shape[0]
    H, E, SLAB = packed["H"], packed["E"], packed["SLAB"]

    # Embedding lookup (data-dependent gather) stays in XLA glue.
    emb = jnp.take(packed["embedding"], input_ids, axis=0)   # [B, H]

    full = lambda shape: pl.BlockSpec(shape, lambda: tuple(0 for _ in shape))

    slab = pl.pallas_call(
        _rnn_cell_kernel,
        out_shape=jax.ShapeDtypeStruct((B, SLAB), jnp.float32),
        grid=(),
        in_specs=[
            full(emb.shape),
            full(hidden.shape),
            full(packed["a_emb"].shape),
            full(packed["a_hid"].shape),
            full(packed["b_tot"].shape),
        ],
        out_specs=full((B, SLAB)),
    )(emb, hidden, packed["a_emb"], packed["a_hid"], packed["b_tot"])

    new_hidden = slab[:, :H]
    output = slab[:, H:H + E]
    return output, new_hidden


def rnn_forward_sequence(seq_ids, hidden0, packed):
    """T timesteps in ONE pallas_call (grid=(T,)).  Semantically identical to
    calling RNN.forward in a Python loop over seq_ids[t]."""
    T, B = seq_ids.shape
    H, E, SLAB = packed["H"], packed["E"], packed["SLAB"]
    hp = jax.lax.Precision.HIGHEST

    # XLA glue: embedding gather + hoisted non-recurrent projection as one
    # large MXU-friendly matmul (bias folded in).  Only hid @ A_hid remains in
    # the per-step recurrence below.
    emb = jnp.take(packed["embedding"], seq_ids.reshape(-1), axis=0)      # [T*B, H]
    emb_proj = (jnp.dot(emb, packed["a_emb"], precision=hp)
                + packed["b_tot"]).reshape(T, B, SLAB)                    # [T, B, SLAB]

    grid_spec = pltpu.PrefetchScalarGridSpec(
        num_scalar_prefetch=0,
        grid=(T,),
        in_specs=[
            pl.BlockSpec((B, H), lambda t: (0, 0)),           # h0 (resident)
            pl.BlockSpec((1, B, SLAB), lambda t: (t, 0, 0)),  # emb_proj[t]
            pl.BlockSpec((H, SLAB), lambda t: (0, 0)),        # A_hid (resident)
        ],
        out_specs=[
            pl.BlockSpec((1, B, SLAB), lambda t: (t, 0, 0)),  # slab per step
            pl.BlockSpec((B, H), lambda t: (0, 0)),           # final hidden
        ],
        scratch_shapes=[pltpu.VMEM((B, H), jnp.float32)],
    )

    slab_seq, h_final = pl.pallas_call(
        _rnn_seq_kernel,
        out_shape=(jax.ShapeDtypeStruct((T, B, SLAB), jnp.float32),
                   jax.ShapeDtypeStruct((B, H), jnp.float32)),
        grid_spec=grid_spec,
        compiler_params=pltpu.CompilerParams(dimension_semantics=("arbitrary",)),
    )(hidden0, emb_proj, packed["a_hid"])

    outputs = slab_seq[:, :, H:H + E]   # one slice per call (not per step)
    return outputs, h_final


# --------------------------------------------------------------------------
# Init (matches the PyTorch module's shapes; Linear weights stored [in, out])
# --------------------------------------------------------------------------
def init_params(key, dictionary_size, hidden_size, embedding_size):
    k = jax.random.split(key, 7)
    H, E, V = hidden_size, embedding_size, dictionary_size

    def lin_w(kk, fan_in, fan_out):
        bound = 1.0 / jnp.sqrt(fan_in)
        return jax.random.uniform(kk, (fan_in, fan_out), jnp.float32, -bound, bound)

    def lin_b(kk, fan_in, fan_out):
        bound = 1.0 / jnp.sqrt(fan_in)
        return jax.random.uniform(kk, (1, fan_out), jnp.float32, -bound, bound)

    return {
        "embedding": jax.random.normal(k[0], (V, H), jnp.float32),  # nn.Embedding ~ N(0,1)
        "i2h_w": lin_w(k[1], 2 * H, H),
        "i2h_b": lin_b(k[2], 2 * H, H),
        "i2o_w": lin_w(k[3], 2 * H, H),
        "i2o_b": lin_b(k[4], 2 * H, H),
        "o2o_w": lin_w(k[5], 2 * H, E),
        "o2o_b": lin_b(k[6], 2 * H, E),
    }


if __name__ == "__main__":
    dictionary_size = 100
    hidden_size = 32
    embedding_size = 48
    batch = 8
    seq_len = 6

    key = jax.random.PRNGKey(0)
    kp, ki, kh, ks = jax.random.split(key, 4)

    raw = init_params(kp, dictionary_size, hidden_size, embedding_size)
    packed = pack_params(raw)

    hp = jax.lax.Precision.HIGHEST

    def ref_step(ids, hid):
        emb = jnp.take(raw["embedding"], ids, axis=0)
        ic = jnp.concatenate([emb, hid], axis=1)
        h = jnp.dot(ic, raw["i2h_w"], precision=hp) + raw["i2h_b"]
        o = jnp.dot(ic, raw["i2o_w"], precision=hp) + raw["i2o_b"]
        oc = jnp.concatenate([h, o], axis=1)
        out = jnp.dot(oc, raw["o2o_w"], precision=hp) + raw["o2o_b"]
        return out, h

    # ---- single-step cell (mirrors RNN.forward) ----
    input_ids = jax.random.randint(ki, (batch,), 0, dictionary_size, dtype=jnp.int32)
    hidden0 = 0.1 * jax.random.normal(kh, (batch, hidden_size), jnp.float32)

    out, new_hidden = rnn_forward(input_ids, hidden0, packed)
    jax.block_until_ready((out, new_hidden))

    out_ref, h_ref = ref_step(input_ids, hidden0)
    assert out.shape == (batch, embedding_size)
    assert new_hidden.shape == (batch, hidden_size)
    assert jnp.allclose(out, out_ref, atol=1e-3), "single-step output mismatch"
    assert jnp.allclose(new_hidden, h_ref, atol=1e-3), "single-step hidden mismatch"

    # ---- fused T-step sequence kernel ----
    seq_ids = jax.random.randint(ks, (seq_len, batch), 0, dictionary_size,
                                 dtype=jnp.int32)
    outs, h_T = rnn_forward_sequence(seq_ids, hidden0, packed)
    jax.block_until_ready((outs, h_T))

    h = hidden0
    refs = []
    for t in range(seq_len):
        o_t, h = ref_step(seq_ids[t], h)
        refs.append(o_t)
    outs_ref = jnp.stack(refs, axis=0)

    assert outs.shape == (seq_len, batch, embedding_size)
    assert h_T.shape == (batch, hidden_size)
    assert jnp.allclose(outs, outs_ref, atol=1e-3), "sequence output mismatch"
    assert jnp.allclose(h_T, h, atol=1e-3), "sequence hidden mismatch"

    print("KERNEL_OK")
</pallas_src>

<mosaic_0001>
module attributes {stable_mosaic.version = 11 : i64} {
  func.func @_rnn_cell_kernel(%arg0: memref<8x32xf32, #tpu.memory_space<vmem>>, %arg1: memref<8x32xf32, #tpu.memory_space<vmem>>, %arg2: memref<32x128xf32, #tpu.memory_space<vmem>>, %arg3: memref<32x128xf32, #tpu.memory_space<vmem>>, %arg4: memref<1x128xf32, #tpu.memory_space<vmem>>, %arg5: memref<8x128xf32, #tpu.memory_space<vmem>>) attributes {dimension_semantics = [], scalar_prefetch = 0 : i64, scratch_operands = 0 : i64, tpu.core_type = #tpu.core_type<tc>} {
    %c0 = arith.constant 0 : index
    %c0_0 = arith.constant 0 : index
    %0 = vector.load %arg0[%c0, %c0_0] : memref<8x32xf32, #tpu.memory_space<vmem>>, vector<8x32xf32>
    %c0_1 = arith.constant 0 : index
    %c0_2 = arith.constant 0 : index
    %1 = vector.load %arg2[%c0_1, %c0_2] : memref<32x128xf32, #tpu.memory_space<vmem>>, vector<32x128xf32>
    %cst = arith.constant dense<0.000000e+00> : vector<8x128xf32>
    %2 = tpu.matmul %0, %1, %cst {dimension_numbers = #tpu.dot_dimension_numbers<[1], [0], [0], [1], [0, 0, 1, 1], [], []>} : vector<8x32xf32>, vector<32x128xf32>, vector<8x128xf32> -> vector<8x128xf32>
    %c0_3 = arith.constant 0 : index
    %c0_4 = arith.constant 0 : index
    %3 = vector.load %arg1[%c0_3, %c0_4] : memref<8x32xf32, #tpu.memory_space<vmem>>, vector<8x32xf32>
    %c0_5 = arith.constant 0 : index
    %c0_6 = arith.constant 0 : index
    %4 = vector.load %arg3[%c0_5, %c0_6] : memref<32x128xf32, #tpu.memory_space<vmem>>, vector<32x128xf32>
    %cst_7 = arith.constant dense<0.000000e+00> : vector<8x128xf32>
    %5 = tpu.matmul %3, %4, %cst_7 {dimension_numbers = #tpu.dot_dimension_numbers<[1], [0], [0], [1], [0, 0, 1, 1], [], []>} : vector<8x32xf32>, vector<32x128xf32>, vector<8x128xf32> -> vector<8x128xf32>
    %6 = arith.addf %2, %5 : vector<8x128xf32>
    %c0_8 = arith.constant 0 : index
    %c0_9 = arith.constant 0 : index
    %7 = vector.load %arg4[%c0_8, %c0_9] : memref<1x128xf32, #tpu.memory_space<vmem>>, vector<1x128xf32>
    %8 = vector.broadcast %7 : vector<1x128xf32> to vector<8x128xf32>
    %9 = arith.addf %6, %8 : vector<8x128xf32>
    %c0_10 = arith.constant 0 : index
    %c0_11 = arith.constant 0 : index
    %10 = vector.load %arg5[%c0_10, %c0_11] : memref<8x128xf32, #tpu.memory_space<vmem>>, vector<8x128xf32>
    tpu.vector_store %arg5[%c0_10, %c0_11], %9 {strides = array<i32>} : memref<8x128xf32, #tpu.memory_space<vmem>>, vector<8x128xf32>,
    return
  }
}

</mosaic_0001>

<bundles_post_ra>
// kernel: tpu_custom_call.1
= control target key start
LH: loop header
LB: loop body
LE: loop exit
PB: predicated region body
PF: predicated region fallthrough
CT: control target
= control target key end

     0   :  { %10 = vsyncpa [#allocation3], 0  ;;  %s464_s0 = inlined_call_operand.hbm [shape: f32[8,32], index: 0, kind: input, shape index: {}]   ;;  %s465_s1 = inlined_call_operand.hbm [shape: f32[8,32], index: 1, kind: input, shape index: {}]   ;;  %s466_s2 = inlined_call_operand.hbm [shape: f32[32,128], index: 2, kind: input, shape index: {}]   ;;  %s467_s3 = inlined_call_operand.hbm [shape: f32[32,128], index: 3, kind: input, shape index: {}]   ;;  %s468_s4 = inlined_call_operand.vmem [shape: f32[1,128], index: 4, kind: input, shape index: {}]   ;;  %s469_s5 = inlined_call_operand.hbm [shape: f32[8,128], index: 5, kind: output, shape index: {}]  }
   0x1   :  { %11 = vsyncpa [#allocation6], 0 }
   0x2   :  { %12 = vsyncpa [#allocation9], 0 }
   0x3   :  { %13 = vsyncpa [#allocation4], 0  ;;  %s407_s18 = smov [#allocation5]   ;;  %s408_s20 = smov [#allocation2]  }
   0x4   :  { %s30_s19 = sshll.u32 %s407_s18, 4  ;;  %s20_s21 = sshll.u32 %s408_s20, 4  ;;  %s31_s19 = int_to_ptr.vmem [resolvable:$true] %s30_s19  ;;  %s21_s21 = int_to_ptr.vmem [resolvable:$true] %s20_s21 }
   0x5   :  { %s307_s22 = scalar_lea.vmem %s31_s19, 128  ;;  %p312_p1 = scmp.lt.s32.totalorder %s31_s19, %s31_s19 }
   0x6   :  { %p308_p0 = scmp.ne.s32.totalorder %s31_s19, %s307_s22  ;;  %p313_p2 = scmp.lt.s32.totalorder %s307_s22, %s307_s22 }
   0x8   :  { %p314_p3 = por %p313_p2, %p312_p1 }
   0xa   :  { %p315_p4 = pnand %p314_p3, %p308_p0 }
   0xc   :  { %318 = shalt.err (!%p315_p4)
}
   0xd   :  { %33 = dma.hbm_to_vmem [thread:$0]  %s465_s1, 128, %s31_s19, [#allocation6]  }
   0xe   :  { %s327_s25 = scalar_lea.vmem %s21_s21, 128  ;;  %p332_p6 = scmp.lt.s32.totalorder %s21_s21, %s21_s21 }
   0xf   :  { %p328_p5 = scmp.ne.s32.totalorder %s21_s21, %s327_s25  ;;  %p333_p7 = scmp.lt.s32.totalorder %s327_s25, %s327_s25 }
  0x11   :  { %p334_p8 = por %p333_p7, %p332_p6 }
  0x13   :  { %p335_p9 = pnand %p334_p8, %p328_p5 }
  0x15   :  { %338 = shalt.err (!%p335_p9)
}
  0x16   :  { %23 = dma.hbm_to_vmem [thread:$0]  %s464_s0, 128, %s21_s21, [#allocation3]  }
  0x17   :  { %s409_s28 = smov [#allocation7]  }
  0x18   :  { %s39_s29 = sshll.u32 %s409_s28, 4  ;;  %s40_s29 = int_to_ptr.vmem [resolvable:$true] %s39_s29 }
  0x19   :  { %s347_s30 = scalar_lea.vmem %s40_s29, 512  ;;  %p352_p11 = scmp.lt.s32.totalorder %s40_s29, %s40_s29 }
  0x1a   :  { %p348_p10 = scmp.ne.s32.totalorder %s40_s29, %s347_s30  ;;  %p353_p12 = scmp.lt.s32.totalorder %s347_s30, %s347_s30 }
  0x1c   :  { %p354_p13 = por %p353_p12, %p352_p11 }
  0x1e   :  { %p355_p0 = pnand %p354_p13, %p348_p10 }
  0x20   :  { %358 = shalt.err (!%p355_p0)
}
  0x21   :  { %s410_s1 = smov 128   ;;  %s411_s6 = smov 8  }
  0x22   :  { %45 = dma.hbm_to_vmem [thread:$0]  %s466_s2, 512, %s40_s29, [#allocation6], %s410_s1, %s410_s1, %s411_s6  }
  0x23   :  { %s412_s9 = smov [#allocation8]  }
  0x24   :  { %s51_s10 = sshll.u32 %s412_s9, 4  ;;  %s52_s10 = int_to_ptr.vmem [resolvable:$true] %s51_s10 }
  0x25   :  { %s367_s0 = scalar_lea.vmem %s52_s10, 512  ;;  %p372_p2 = scmp.lt.s32.totalorder %s52_s10, %s52_s10 }
  0x26   :  { %p368_p1 = scmp.ne.s32.totalorder %s52_s10, %s367_s0  ;;  %p373_p3 = scmp.lt.s32.totalorder %s367_s0, %s367_s0 }
  0x28   :  { %p374_p4 = por %p373_p3, %p372_p2 }
  0x2a   :  { %p375_p5 = pnand %p374_p4, %p368_p1 }
  0x2c   :  { %378 = shalt.err (!%p375_p5)
}
  0x2d   :  { %57 = dma.hbm_to_vmem [thread:$0]  %s467_s3, 512, %s52_s10, [#allocation9], %s410_s1, %s410_s1, %s411_s6  }
  0x2e   :  { %399 = dma.done.wait [#allocation3], 128  }
  0x2f   :  { %400 = vsyncadd [#allocation3], 4294967168 }
  0x30   :  { %401 = dma.done.wait [#allocation6], 640  }
  0x31   :  { %402 = vsyncadd [#allocation6], 4294966656 }
  0x32   :  { %403 = dma.done.wait [#allocation9], 512  }
  0x33   :  { %404 = vsyncadd [#allocation9], 4294966784  ;;  %v413_v0 = vmov 0.0   ;;  %vm414_vm0 = vmmov 0   ;;  %v81_v1 = vld [vmem:[#allocation8 + $0x18] sm:$0xff]  ;;  %v80_v3 = vld [vmem:[#allocation8 + $0x10] sm:$0xff] }
  0x34   :  { %268 = vmatprep.subr.mxu0 %v413_v0  ;;  %279 = vmatprep.subr.mxu1 %v413_v0  ;;  %v76_v2 = vld [vmem:[#allocation7 + $0x18] sm:$0xff]  ;;  %v75_v4 = vld [vmem:[#allocation7 + $0x10] sm:$0xff]  ;;  %v79_v5 = vld [vmem:[#allocation8 + $0x8] sm:$0xff]  ;;  %vm82_vm1 = vcmask 261120   ;;  %s415_s13 = smov [#allocation10]  }
  0x35   :  { %276 = vmatprep.mubr.msk.f32.mxu0 %vm414_vm0, %v413_v0  ;;  %287 = vmatprep.mubr.msk.f32.mxu1 %vm414_vm0, %v413_v0  ;;  %v74_v6 = vld [vmem:[#allocation7 + $0x8] sm:$0xff]  ;;  %v78_v7 = vld [vmem:[#allocation8] sm:$0xff]  ;;  %v77_v9 = vld [vmem:[#allocation5] sm:$0xff]  ;;  %s244_s14 = sshll.u32 %s415_s13, 4  ;;  %s245_s14 = int_to_ptr.vmem [resolvable:$true] %s244_s14 }
  0x36   :  { %269 = vmatpush3.msra.mxu0 %v81_v1  ;;  %280 = vmatpush3.msra.mxu1 %v76_v2  ;;  %v73_v8 = vld [vmem:[#allocation7] sm:$0xff]  ;;  %v72_v10 = vld [vmem:[#allocation2] sm:$0xff]  ;;  %s379_s15 = scalar_lea.vmem %s245_s14, 128  ;;  %p384_p7 = scmp.lt.s32.totalorder %s245_s14, %s245_s14 }
  0x37   :  { %270 = vmatprep.subr.mxu0 %v413_v0  ;;  %281 = vmatprep.subr.mxu1 %v413_v0  ;;  %v257_v13 = vld [vmem:[%s468_s4] ss:$0 sm:$0xff]  ;;  %p380_p6 = scmp.ne.s32.totalorder %s245_s14, %s379_s15  ;;  %p385_p8 = scmp.lt.s32.totalorder %s379_s15, %s379_s15 }
  0x38   :  { %271 = vmatpush3.msra.mxu0 %v80_v3  ;;  %282 = vmatpush3.msra.mxu1 %v75_v4 }
  0x39   :  { %272 = vmatprep.subr.mxu0 %v413_v0  ;;  %283 = vmatprep.subr.mxu1 %v413_v0  ;;  %p386_p9 = por %p385_p8, %p384_p7 }
  0x3a   :  { %273 = vmatpush3.msra.mxu0 %v79_v5  ;;  %284 = vmatpush3.msra.mxu1 %v74_v6 }
  0x3b   :  { %274 = vmatprep.subr.mxu0 %v413_v0  ;;  %285 = vmatprep.subr.mxu1 %v413_v0  ;;  %p387_p10 = pnand %p386_p9, %p380_p6 }
  0x3c   :  { %275 = vmatpush3.msra.mxu0 %v78_v7  ;;  %286 = vmatpush3.msra.mxu1 %v73_v8 }
  0x3d   :  { %277 = vmatmul.mubr.msk.f32.vlgmr.msra.gmra.mxu0 %vm82_vm1, %v77_v9  ;;  %288 = vmatmul.mubr.msk.f32.vlgmr.msra.gmra.mxu1 %vm82_vm1, %v72_v10 }
  0xfd   :  { %v152_v11 = vpop.f32.mrf.mxu0  ;;  %v225_v12 = vpop.f32.mrf.mxu1 }
  0xfe   :  { %v226_v14 = vadd.f32 %v225_v12, %v152_v11 }
  0xff   :  { %v278_v15 = vpop.f32.mrf.mxu0  ;;  %v289_v16 = vpop.f32.mrf.mxu1 }
 0x100   :  { %v236_v17 = vadd.f32 %v257_v13, %v226_v14 }
 0x102   :  { %237 = vst [vmem:[#allocation10] sm:$0xff] %v236_v17 }
 0x103   :  { %390 = shalt.err (!%p387_p10)
}
 0x104   :  { %247 = dma.vmem_to_hbm [thread:$0]  %s245_s14, 128, %s469_s5, [#allocation4]  }
 0x105   :  { %405 = dma.done.wait [#allocation4], 128  }
 0x106   :  { %406 = vsyncadd [#allocation4], 4294967168 }
 0x107   :  { %251 = vsyncpa [#allocation3], 1 }
 0x108   :  { %252 = vsyncpa [#allocation6], 1 }
 0x109   :  { %253 = vsyncpa [#allocation9], 1 }
 0x10a   :  { %254 = vsyncpa [#allocation4], 1 }

</bundles_post_ra>
